<compile_context>
chip_gen: v7x
topology: tpu7x:2x2x1
jax: 0.10.0
libtpu: 0.0.40
codegen_flags: <defaults>
</compile_context>

<pallas_src>
import functools

import numpy as np
import jax
import jax.numpy as jnp
from jax.experimental import pallas as pl
from jax.experimental.pallas import tpu as pltpu

_LANE = 128
_SUBLANE = 8
_VMEM_BUDGET = 40 * 1024 * 1024      # data-buffer budget (fits v7x 64 MiB VMEM)
_VMEM_LIMIT_CAP = 64 * 1024 * 1024   # never ask for more than v7x physical VMEM


def _round_up(x, m):
    return (x + m - 1) // m * m


def _pad_feature_dim(d):
    """Lane-dense padded feature dim + output-column tile size."""
    dp = _round_up(d, _LANE)
    if dp <= 2048:
        tile_d = dp          # whole weight resident (single column block)
    elif dp <= 8192:
        tile_d = 512         # column-tile; multiple of 256 matches v6e/v7x MXU
        dp = _round_up(dp, tile_d)
    else:
        tile_d = 256
        dp = _round_up(dp, tile_d)
    return dp, tile_d


def _autoencoder_kernel(x_ref, wt_ref, b_ref, o_ref):
    # Linear: y = x @ W^T + b  (W^T pre-materialized; MXU matmul, f32 accumulate)
    y = jnp.dot(x_ref[...], wt_ref[...], preferred_element_type=jnp.float32)
    y = y + b_ref[...]                    # bias / epilogue kept in f32
    y = jnp.where(y > 0, y, 0.01 * y)     # LeakyReLU (PyTorch default slope 0.01)
    # decoder is an empty nn.Sequential -> identity; single lane-dense store
    o_ref[...] = y.astype(o_ref.dtype)


@functools.partial(jax.jit,
                   static_argnames=("orig_d", "d_pad", "tile_d", "compute_dtype"))
def _forward_padded(x, wt_pad, b_pad, *, orig_d, d_pad, tile_d, compute_dtype):
    n = x.shape[0]
    out_dtype = x.dtype
    grid_d = d_pad // tile_d

    x_bytes = np.dtype(compute_dtype).itemsize
    out_bytes = np.dtype(out_dtype).itemsize
    w_block_bytes = d_pad * tile_d * x_bytes

    # The weight block's index_map is constant when grid_d == 1; double
    # buffering it is pure VMEM waste, so single-buffer when it is large.
    single_buf_w = (grid_d == 1) and (w_block_bytes > 4 * 1024 * 1024)
    w_bufs = 1 if single_buf_w else 2

    # Row tile: as large as the VMEM budget allows (measured ~3x better HBM
    # utilization at 512-1024 rows vs 128), multiple of 8 sublanes, cap 1024.
    fixed = w_bufs * w_block_bytes + 2 * tile_d * 4
    per_row = 2 * d_pad * x_bytes + 2 * tile_d * out_bytes
    tile_n = max(_VMEM_BUDGET - fixed, 0) // per_row
    tile_n = max(_SUBLANE, min(1024, (tile_n // _SUBLANE) * _SUBLANE))
    tile_n = min(tile_n, _round_up(n, _SUBLANE))
    if n > 512:
        # keep >= 2 row-grid steps so both v7x TensorCores get work
        tile_n = min(tile_n, _round_up((n + 1) // 2, _SUBLANE))

    n_pad = _round_up(n, tile_n)
    x_p = jnp.pad(x.astype(compute_dtype),
                  ((0, n_pad - n), (0, d_pad - x.shape[1])))

    vmem_est = (w_bufs * w_block_bytes
                + 2 * tile_n * d_pad * x_bytes
                + 2 * tile_n * tile_d * out_bytes
                + 2 * tile_d * 4)
    vmem_limit = min(_VMEM_LIMIT_CAP, vmem_est + 8 * 1024 * 1024)

    w_spec_kwargs = {"pipeline_mode": pl.Buffered(1)} if single_buf_w else {}

    out_p = pl.pallas_call(
        _autoencoder_kernel,
        out_shape=jax.ShapeDtypeStruct((n_pad, d_pad), out_dtype),
        grid_spec=pltpu.PrefetchScalarGridSpec(
            num_scalar_prefetch=0,
            # column axis innermost so the x row-tile is reused across it
            grid=(n_pad // tile_n, grid_d),
            in_specs=[
                pl.BlockSpec((tile_n, d_pad), lambda i, j: (i, 0)),   # x rows
                pl.BlockSpec((d_pad, tile_d), lambda i, j: (0, j),    # W^T cols
                             **w_spec_kwargs),
                pl.BlockSpec((1, tile_d), lambda i, j: (0, j)),       # bias
            ],
            out_specs=pl.BlockSpec((tile_n, tile_d), lambda i, j: (i, j)),
        ),
        compiler_params=pltpu.CompilerParams(
            dimension_semantics=("parallel", "parallel"),
            vmem_limit_bytes=int(vmem_limit),
        ),
    )(x_p, wt_pad, b_pad)

    return out_p[:n, :orig_d]


def make_autoencoder_forward(weight, bias, *, compute_dtype=jnp.float32):
    """Prepare (transpose + lane-pad) the nn.Linear params once and return a
    jitted forward(x) for x of shape (N, D). weight is PyTorch layout (out, in)."""
    d = weight.shape[0]
    assert weight.shape == (d, d) and bias.shape == (d,)
    d_pad, tile_d = _pad_feature_dim(d)

    wt_pad = jnp.pad(weight.T.astype(compute_dtype),
                     ((0, d_pad - d), (0, d_pad - d)))   # (in, out), zero-padded
    b_pad = jnp.pad(bias.astype(jnp.float32), (0, d_pad - d)).reshape(1, d_pad)

    def forward(x):
        return _forward_padded(x, wt_pad, b_pad, orig_d=d, d_pad=d_pad,
                               tile_d=tile_d, compute_dtype=compute_dtype)

    return forward


def autoencoder_forward_ref(x, weight, bias):
    y = jnp.dot(x, weight.T, precision=jax.lax.Precision.HIGHEST) + bias
    return jnp.where(y > 0, y, 0.01 * y)


if __name__ == "__main__":
    key = jax.random.PRNGKey(0)
    k_x, k_w, k_b, k_x2 = jax.random.split(key, 4)

    # Shapes consistent with the module: features (N, input_dim)
    N, D = 8, 32
    bound = 1.0 / float(np.sqrt(D))
    x = jax.random.normal(k_x, (N, D), dtype=jnp.float32)
    weight = jax.random.uniform(k_w, (D, D), minval=-bound, maxval=bound,
                                dtype=jnp.float32)
    bias = jax.random.uniform(k_b, (D,), minval=-bound, maxval=bound,
                              dtype=jnp.float32)
    ref = autoencoder_forward_ref(x, weight, bias)

    # f32 MXU path
    fwd_f32 = make_autoencoder_forward(weight, bias, compute_dtype=jnp.float32)
    out = jax.block_until_ready(fwd_f32(x))
    assert out.shape == (N, D)
    assert jnp.allclose(out, ref, atol=1e-4, rtol=1e-4), "f32 mismatch vs reference"

    # bf16 MXU path (f32 accumulation + f32 epilogue) — looser tolerance
    fwd_bf16 = make_autoencoder_forward(weight, bias, compute_dtype=jnp.bfloat16)
    out16 = jax.block_until_ready(fwd_bf16(x))
    assert out16.shape == (N, D)
    assert jnp.allclose(out16, ref, atol=3e-2, rtol=3e-2), "bf16 mismatch vs reference"

    # Non-aligned shape: exercises row/column padding and a multi-step row grid
    N2, D2 = 600, 160
    bound2 = 1.0 / float(np.sqrt(D2))
    x2 = jax.random.normal(k_x2, (N2, D2), dtype=jnp.float32)
    w2 = jax.random.uniform(k_w, (D2, D2), minval=-bound2, maxval=bound2,
                            dtype=jnp.float32)
    b2 = jax.random.uniform(k_b, (D2,), minval=-bound2, maxval=bound2,
                            dtype=jnp.float32)
    fwd2 = make_autoencoder_forward(w2, b2, compute_dtype=jnp.float32)
    out2 = jax.block_until_ready(fwd2(x2))
    ref2 = autoencoder_forward_ref(x2, w2, b2)
    assert out2.shape == (N2, D2)
    assert jnp.allclose(out2, ref2, atol=1e-4, rtol=1e-4), "tiled/padded mismatch vs reference"

    print("KERNEL_OK")
</pallas_src>

<mosaic_0001>
module attributes {stable_mosaic.version = 11 : i64} {
  func.func @_autoencoder_kernel(%arg0: i32, %arg1: i32, %arg2: memref<8x128xf32, #tpu.memory_space<vmem>>, %arg3: memref<128x128xf32, #tpu.memory_space<vmem>>, %arg4: memref<1x128xf32, #tpu.memory_space<vmem>>, %arg5: memref<8x128xf32, #tpu.memory_space<vmem>>) attributes {dimension_semantics = [#tpu.dimension_semantics<parallel>, #tpu.dimension_semantics<parallel>], iteration_bounds = array<i64: 1, 1>, scalar_prefetch = 0 : i64, scratch_operands = 0 : i64, tpu.core_type = #tpu.core_type<tc>, window_params = [{transform_indices = @transform_0, window_bounds = array<i64: 8, 128>}, {transform_indices = @transform_1, window_bounds = array<i64: 128, 128>}, {transform_indices = @transform_2, window_bounds = array<i64: 1, 128>}, {transform_indices = @transform_3, window_bounds = array<i64: 8, 128>}]} {
    %c0 = arith.constant 0 : index
    %c0_0 = arith.constant 0 : index
    %0 = vector.load %arg2[%c0, %c0_0] : memref<8x128xf32, #tpu.memory_space<vmem>>, vector<8x128xf32>
    %c0_1 = arith.constant 0 : index
    %c0_2 = arith.constant 0 : index
    %1 = vector.load %arg3[%c0_1, %c0_2] : memref<128x128xf32, #tpu.memory_space<vmem>>, vector<128x128xf32>
    %cst = arith.constant dense<0.000000e+00> : vector<8x128xf32>
    %2 = tpu.matmul %0, %1, %cst {dimension_numbers = #tpu.dot_dimension_numbers<[1], [0], [0], [1], [0, 0, 1, 1], [], []>} : vector<8x128xf32>, vector<128x128xf32>, vector<8x128xf32> -> vector<8x128xf32>
    %c0_3 = arith.constant 0 : index
    %c0_4 = arith.constant 0 : index
    %3 = vector.load %arg4[%c0_3, %c0_4] : memref<1x128xf32, #tpu.memory_space<vmem>>, vector<1x128xf32>
    %4 = vector.broadcast %3 : vector<1x128xf32> to vector<8x128xf32>
    %5 = arith.addf %2, %4 : vector<8x128xf32>
    %cst_5 = arith.constant 0.000000e+00 : f32
    %6 = vector.broadcast %cst_5 : f32 to vector<8x128xf32>
    %7 = arith.cmpf ogt, %5, %6 : vector<8x128xf32>
    %cst_6 = arith.constant 0.00999999977 : f32
    %8 = vector.broadcast %cst_6 : f32 to vector<8x128xf32>
    %9 = arith.mulf %8, %5 : vector<8x128xf32>
    %10 = arith.select %7, %5, %9 : vector<8x128xi1>, vector<8x128xf32>
    %c0_7 = arith.constant 0 : index
    %c0_8 = arith.constant 0 : index
    %11 = vector.load %arg5[%c0_7, %c0_8] : memref<8x128xf32, #tpu.memory_space<vmem>>, vector<8x128xf32>
    tpu.vector_store %arg5[%c0_7, %c0_8], %10 {strides = array<i32>} : memref<8x128xf32, #tpu.memory_space<vmem>>, vector<8x128xf32>,
    return
  }
  func.func @transform_0(%arg0: i32, %arg1: i32) -> (i32, i32) {
    %c0_i32 = arith.constant 0 : i32
    %c0_i32_0 = arith.constant 0 : i32
    return %arg0, %c0_i32 : i32, i32
  }
  func.func @transform_1(%arg0: i32, %arg1: i32) -> (i32, i32) {
    %c0_i32 = arith.constant 0 : i32
    %c0_i32_0 = arith.constant 0 : i32
    return %c0_i32, %arg1 : i32, i32
  }
  func.func @transform_2(%arg0: i32, %arg1: i32) -> (i32, i32) {
    %c0_i32 = arith.constant 0 : i32
    %c0_i32_0 = arith.constant 0 : i32
    return %c0_i32, %arg1 : i32, i32
  }
  func.func @transform_3(%arg0: i32, %arg1: i32) -> (i32, i32) {
    %c0_i32 = arith.constant 0 : i32
    return %arg0, %arg1 : i32, i32
  }
}

</mosaic_0001>

<bundles_post_ra>
// kernel: _forward_padded.1
= control target key start
LH: loop header
LB: loop body
LE: loop exit
PB: predicated region body
PF: predicated region fallthrough
CT: control target
= control target key end

     0   :  { %8 = vsyncpa [#allocation3], 0  ;;  %s331_s0 = inlined_call_operand.vmem [shape: f32[8,128], index: 0, kind: input, shape index: {}]   ;;  %s332_s1 = inlined_call_operand.hbm [shape: f32[128,128], index: 1, kind: input, shape index: {}]   ;;  %s333_s2 = inlined_call_operand.vmem [shape: f32[1,128], index: 2, kind: input, shape index: {}]   ;;  %s334_s3 = inlined_call_operand.hbm [shape: f32[8,128], index: 3, kind: output, shape index: {}]  }
   0x1   :  { %9 = vsyncpa [#allocation4], 0  ;;  %s274_s12 = smov [#allocation2]   ;;  %s226_s16 = scalar_lea.hbm %s332_s1, 2048 }
   0x2   :  { %s17_s13 = sshll.u32 %s274_s12, 4  ;;  %p227_p0 = scmp.ne.s32.totalorder %s332_s1, %s226_s16  ;;  %s18_s13 = int_to_ptr.vmem [resolvable:$true] %s17_s13 }
   0x3   :  { %p230_p1 = scmp.lt.u32.totalorder %s226_s16, %s332_s1 }
   0x5   :  { %p232_p2 = pnand %p230_p1, %p227_p0 }
   0x7   :  { %235 = shalt.err (!%p232_p2)
}
   0x8   :  { %s236_s21 = scalar_lea.vmem %s18_s13, 2048  ;;  %p241_p4 = scmp.lt.s32.totalorder %s18_s13, %s18_s13 }
   0x9   :  { %p237_p3 = scmp.ne.s32.totalorder %s18_s13, %s236_s21  ;;  %p242_p5 = scmp.lt.s32.totalorder %s236_s21, %s236_s21 }
   0xb   :  { %p243_p6 = por %p242_p5, %p241_p4 }
   0xd   :  { %p244_p7 = pnand %p243_p6, %p237_p3 }
   0xf   :  { %247 = shalt.err (!%p244_p7)
}
  0x10   :  { %s275_s22 = smov 128   ;;  %s276_s23 = smov 8  }
  0x11   :  { %23 = dma.hbm_to_vmem [thread:$0]  %s332_s1, 2048, %s18_s13, [#allocation3], %s275_s22, %s275_s22, %s276_s23  }
  0x12   :  { %270 = dma.done.wait [#allocation3], 2048  }
  0x13   :  { %271 = vsyncadd [#allocation3], 4294965248  ;;  %v277_v0 = vmov 0.0|0.0   ;;  %vm278_vm0 = vmmov 0   ;;  %v279_v1 = vmov 0.0   ;;  %v30_v2 = vld [vmem:[#allocation2] sm:$0xff] }
  0x14   :  { %195 = vmatprep.subr.bf16.mxu0 %v277_v0  ;;  %192 = vmatprep.mubr.msk.f32.mxu0 %vm278_vm0, %v279_v1  ;;  %v31_v3 = vld [vmem:[#allocation2 + $0x8] sm:$0xff]  ;;  %v32_v4 = vld [vmem:[#allocation2 + $0x10] sm:$0xff]  ;;  %v33_v6 = vld [vmem:[#allocation2 + $0x18] sm:$0xff]  ;;  %s280_s29 = smov [#allocation5]  }
  0x15   :  { %v196_v5 = vpack.c.bf16 %v31_v3, %v30_v2  ;;  %v199_v7 = vpack.c.bf16 %v33_v6, %v32_v4  ;;  %v34_v8 = vld [vmem:[#allocation2 + $0x20] sm:$0xff]  ;;  %v35_v9 = vld [vmem:[#allocation2 + $0x28] sm:$0xff]  ;;  %v36_v11 = vld [vmem:[#allocation2 + $0x30] sm:$0xff]  ;;  %s133_s30 = sshll.u32 %s280_s29, 4  ;;  %s134_s30 = int_to_ptr.vmem [resolvable:$true] %s133_s30 }
  0x16   :  { %v202_v10 = vpack.c.bf16 %v35_v9, %v34_v8  ;;  %v37_v12 = vld [vmem:[#allocation2 + $0x38] sm:$0xff]  ;;  %v38_v14 = vld [vmem:[#allocation2 + $0x40] sm:$0xff]  ;;  %v39_v15 = vld [vmem:[#allocation2 + $0x48] sm:$0xff]  ;;  %s248_s4 = scalar_lea.vmem %s134_s30, 128  ;;  %p253_p9 = scmp.lt.s32.totalorder %s134_s30, %s134_s30 }
  0x17   :  { %197 = vmatpush3.bf16.msra.mxu0 %v196_v5  ;;  %v205_v13 = vpack.c.bf16 %v37_v12, %v36_v11  ;;  %v208_v16 = vpack.c.bf16 %v39_v15, %v38_v14  ;;  %v40_v17 = vld [vmem:[#allocation2 + $0x50] sm:$0xff]  ;;  %v41_v18 = vld [vmem:[#allocation2 + $0x58] sm:$0xff]  ;;  %v42_v20 = vld [vmem:[#allocation2 + $0x60] sm:$0xff]  ;;  %p249_p8 = scmp.ne.s32.totalorder %s134_s30, %s248_s4  ;;  %p254_p10 = scmp.lt.s32.totalorder %s248_s4, %s248_s4 }
  0x18   :  { %198 = vmatprep.subr.bf16.mxu0 %v277_v0  ;;  %v211_v19 = vpack.c.bf16 %v41_v18, %v40_v17  ;;  %v43_v21 = vld [vmem:[#allocation2 + $0x68] sm:$0xff]  ;;  %v44_v23 = vld [vmem:[#allocation2 + $0x70] sm:$0xff]  ;;  %v45_v24 = vld [vmem:[#allocation2 + $0x78] sm:$0xff] }
  0x19   :  { %v214_v22 = vpack.c.bf16 %v43_v21, %v42_v20  ;;  %v217_v25 = vpack.c.bf16 %v45_v24, %v44_v23  ;;  %v29_v26 = vld [vmem:[%s331_s0] sm:$0xff]  ;;  %p255_p11 = por %p254_p10, %p253_p9 }
  0x1a   :  { %v142_v27 = vld [vmem:[%s333_s2] ss:$0 sm:$0xff] }
  0x1b   :  { %200 = vmatpush3.bf16.msra.mxu0 %v199_v7  ;;  %p256_p12 = pnand %p255_p11, %p249_p8 }
  0x1c   :  { %201 = vmatprep.subr.bf16.mxu0 %v277_v0 }
  0x1f   :  { %203 = vmatpush3.bf16.msra.mxu0 %v202_v10 }
  0x20   :  { %204 = vmatprep.subr.bf16.mxu0 %v277_v0 }
  0x23   :  { %206 = vmatpush3.bf16.msra.mxu0 %v205_v13 }
  0x24   :  { %207 = vmatprep.subr.bf16.mxu0 %v277_v0 }
  0x27   :  { %209 = vmatpush3.bf16.msra.mxu0 %v208_v16 }
  0x28   :  { %210 = vmatprep.subr.bf16.mxu0 %v277_v0 }
  0x2b   :  { %212 = vmatpush3.bf16.msra.mxu0 %v211_v19 }
  0x2c   :  { %213 = vmatprep.subr.bf16.mxu0 %v277_v0 }
  0x2f   :  { %215 = vmatpush3.bf16.msra.mxu0 %v214_v22 }
  0x30   :  { %216 = vmatprep.subr.bf16.mxu0 %v277_v0 }
  0x33   :  { %218 = vmatpush3.bf16.msra.mxu0 %v217_v25 }
  0x36   :  { %193 = vmatmul.mubr.f32.vlgmr.msra.gmra.mrb[0].mxu0 %v29_v26 }
 0x109   :  { %v119_v28 = vpop.f32.mrb[0].mxu0 }
 0x10a   :  { %v120_v29 = vadd.f32 %v142_v27, %v119_v28  ;;  %v194_v30 = vpop.f32.mrb[1].mxu0 }
 0x10c   :  { %v124_v31 = vmul.f32 0.01, %v120_v29  ;;  %vm123_vm1 = vcmp.gt.f32.partialorder %v120_v29, 0.0 }
 0x10e   :  { %v125_v32 = vsel %vm123_vm1, %v120_v29, %v124_v31 }
 0x10f   :  { %126 = vst [vmem:[#allocation5] sm:$0xff] %v125_v32 }
 0x110   :  { %259 = shalt.err (!%p256_p12)
}
 0x111   :  { %s260_s2 = scalar_lea.hbm %s334_s3, 128 }
 0x112   :  { %p261_p13 = scmp.ne.s32.totalorder %s334_s3, %s260_s2  ;;  %p264_p0 = scmp.lt.u32.totalorder %s260_s2, %s334_s3 }
 0x114   :  { %p266_p1 = pnand %p264_p0, %p261_p13 }
 0x116   :  { %269 = shalt.err (!%p266_p1)
}
 0x117   :  { %136 = dma.vmem_to_hbm [thread:$0]  %s134_s30, 128, %s334_s3, [#allocation4]  }
 0x118   :  { %272 = dma.done.wait [#allocation4], 128  }
 0x119   :  { %273 = vsyncadd [#allocation4], 4294967168 }
 0x11a   :  { %140 = vsyncpa [#allocation3], 1 }
 0x11b   :  { %141 = vsyncpa [#allocation4], 1 }

</bundles_post_ra>
